<compile_context>
chip_gen: v7x
topology: tpu7x:2x2x1
jax: 0.10.0
libtpu: 0.0.40
codegen_flags: <defaults>
</compile_context>

<pallas_src>
import functools

import jax
import jax.numpy as jnp
from jax.experimental import pallas as pl
from jax.experimental.pallas import tpu as pltpu


def _entropy_sum_kernel(x_ref, ent_ref, cnt_ref, *, hw_total):
    """x_ref: (Fb, HWb) logits (native dtype). Accumulates per-frame
    boundary-entropy sum and boundary-pixel count across the HW grid axis."""
    # Resident per-frame accumulators: init at the first HW chunk.
    @pl.when(pl.program_id(1) == 0)
    def _():
        ent_ref[...] = jnp.zeros_like(ent_ref)
        cnt_ref[...] = jnp.zeros_like(cnt_ref)

    x = x_ref[...].astype(jnp.float32)
    fb, hwb = x.shape

    # Lane-validity for the clamped HW-tail block: out-of-range lanes carry
    # undefined data and must not contribute to the sum or the count.
    lane = jax.lax.broadcasted_iota(jnp.int32, (fb, hwb), 1)
    valid = (pl.program_id(1) * hwb + lane) < hw_total

    # boundary pixel: sigmoid(x) > 0.5  <=>  x > 0 (strict, cv2.THRESH_BINARY)
    mask = (x > 0.0) & valid

    # Binary entropy (natural log) of p = sigmoid(x):
    #   H = ax*(1 - s) - log(s),  s = sigmoid(ax) = 0.5*(1 + tanh(ax/2)), ax = |x|
    # Two EUP ops per pixel (tanh, log); exact.
    ax = jnp.abs(x)
    s = 0.5 * (1.0 + jnp.tanh(0.5 * ax))
    ent = ax * (1.0 - s) - jnp.log(s)
    ent = jnp.where(mask, ent, 0.0)

    ent_ref[...] += jnp.sum(ent, axis=-1, keepdims=True)
    # f32 count is exact while per-frame boundary pixels <= 2^24 (~16.7M px/frame).
    cnt_ref[...] += jnp.sum(mask.astype(jnp.float32), axis=-1, keepdims=True)


def _choose_tiles(n_frames, hw, dtype, target_bytes=4 << 20):
    """Pick (Fb, HWb): ~target_bytes blocks, dtype-aware sublane rounding,
    128-lane alignment (or full HW), and >=2 frame blocks when possible."""
    itemsize = jnp.dtype(dtype).itemsize
    sub = max(8, 32 // itemsize)                 # 8 for f32, 16 for bf16, 32 for i8/fp8

    # Lane (HW) tile: full row if it fits the budget, else a 128-aligned chunk.
    max_lanes = max(128, (target_bytes // (sub * itemsize)) // 128 * 128)
    hwb = hw if hw <= max_lanes else max_lanes

    # Frame tile: fill the block budget, multiple of the sublane packing.
    fb = max(sub, (target_bytes // max(1, hwb * itemsize)) // sub * sub)
    n_round = -(-n_frames // sub) * sub
    fb = min(fb, n_round)

    # Keep >= 2 frame-axis blocks so the "parallel" axis can shard across the
    # two TensorCores on v7x (harmless on single-TC v5e/v6e).
    if fb >= n_frames and n_frames > sub:
        half = -(-n_frames // 2)
        fb = max(sub, -(-half // sub) * sub)
    return fb, hwb


def frame_selection(preds):
    """preds: (B, T, H, W) float logits (f32 or bf16). Returns (B,) int32."""
    B, T, H, W = preds.shape
    N, HW = B * T, H * W
    x = preds.reshape(N, HW)                     # no pad, no dtype change

    Fb, HWb = _choose_tiles(N, HW, x.dtype)
    grid = (pl.cdiv(N, Fb), pl.cdiv(HW, HWb))

    kernel = functools.partial(_entropy_sum_kernel, hw_total=HW)

    ent_sum, cnt = pl.pallas_call(
        kernel,
        grid=grid,
        in_specs=[pl.BlockSpec((Fb, HWb), lambda i, j: (i, j))],
        out_specs=[
            pl.BlockSpec((Fb, 1), lambda i, j: (i, 0)),
            pl.BlockSpec((Fb, 1), lambda i, j: (i, 0)),
        ],
        out_shape=[
            jax.ShapeDtypeStruct((N, 1), jnp.float32),
            jax.ShapeDtypeStruct((N, 1), jnp.float32),
        ],
        compiler_params=pltpu.CompilerParams(
            dimension_semantics=("parallel", "arbitrary"),
        ),
    )(x)

    ent_sum = ent_sum[:, 0].reshape(B, T)
    cnt = cnt[:, 0].reshape(B, T)

    # mean entropy over boundary pixels; 1e6 when no pixel exceeds 0.5
    score = jnp.where(cnt == 0.0, 1e6, ent_sum / jnp.maximum(cnt, 1.0))

    # torch.sort(score, dim=1)[1][:, 0]  ==  first-occurrence argmin
    # TODO(synk): torch returns int64 indices; we return int32 (JAX default).
    return jnp.argmin(score, axis=-1).astype(jnp.int32)


def _frame_selection_ref(preds):
    """Pure-JAX reference of the PyTorch module (for a quick parity check)."""
    p = jax.nn.sigmoid(preds.astype(jnp.float32))
    m = p > 0.5
    ent = -(p * jnp.log(p) + (1.0 - p) * jnp.log1p(-p))
    ent_sum = jnp.where(m, ent, 0.0).sum(axis=(2, 3))
    cnt = m.sum(axis=(2, 3)).astype(jnp.float32)
    score = jnp.where(cnt == 0.0, 1e6, ent_sum / jnp.maximum(cnt, 1.0))
    return jnp.argmin(score, axis=-1).astype(jnp.int32)


if __name__ == "__main__":
    key = jax.random.PRNGKey(0)
    B, T, H, W = 2, 8, 16, 16
    # scale logits so some frames have confident (low-entropy) boundaries
    preds = 3.0 * jax.random.normal(key, (B, T, H, W), dtype=jnp.float32)

    out = frame_selection(preds)
    jax.block_until_ready(out)

    assert out.shape == (B,)
    assert out.dtype == jnp.int32
    ref = _frame_selection_ref(preds)
    assert bool(jnp.all(out == ref)), (out, ref)
    print("KERNEL_OK")
</pallas_src>

<mosaic_0001>
module attributes {stable_mosaic.version = 11 : i64} {
  func.func @_entropy_sum_kernel(%arg0: i32, %arg1: i32, %arg2: memref<8x256xf32, #tpu.memory_space<vmem>>, %arg3: memref<8x1xf32, #tpu.memory_space<vmem>>, %arg4: memref<8x1xf32, #tpu.memory_space<vmem>>) attributes {dimension_semantics = [#tpu.dimension_semantics<parallel>, #tpu.dimension_semantics<arbitrary>], iteration_bounds = array<i64: 2, 1>, scalar_prefetch = 0 : i64, scratch_operands = 0 : i64, tpu.core_type = #tpu.core_type<tc>, window_params = [{transform_indices = @transform_0, window_bounds = array<i64: 8, 256>}, {transform_indices = @transform_1, window_bounds = array<i64: 8, 1>}, {transform_indices = @transform_2, window_bounds = array<i64: 8, 1>}]} {
    %c0_i32 = arith.constant 0 : i32
    %0 = arith.cmpi eq, %arg1, %c0_i32 : i32
    %1 = arith.extui %0 : i1 to i32
    %c0_i32_0 = arith.constant 0 : i32
    %2 = arith.cmpi ne, %1, %c0_i32_0 : i32
    scf.if %2 {
      %cst_18 = arith.constant 0.000000e+00 : f32
      %40 = vector.broadcast %cst_18 : f32 to vector<8x1xf32>
      %c0_19 = arith.constant 0 : index
      %c0_20 = arith.constant 0 : index
      %41 = vector.load %arg3[%c0_19, %c0_20] : memref<8x1xf32, #tpu.memory_space<vmem>>, vector<8x1xf32>
      tpu.vector_store %arg3[%c0_19, %c0_20], %40 {strides = array<i32>} : memref<8x1xf32, #tpu.memory_space<vmem>>, vector<8x1xf32>,
      %cst_21 = arith.constant 0.000000e+00 : f32
      %42 = vector.broadcast %cst_21 : f32 to vector<8x1xf32>
      %c0_22 = arith.constant 0 : index
      %c0_23 = arith.constant 0 : index
      %43 = vector.load %arg4[%c0_22, %c0_23] : memref<8x1xf32, #tpu.memory_space<vmem>>, vector<8x1xf32>
      tpu.vector_store %arg4[%c0_22, %c0_23], %42 {strides = array<i32>} : memref<8x1xf32, #tpu.memory_space<vmem>>, vector<8x1xf32>,
    } else {
    }
    %c0 = arith.constant 0 : index
    %c0_1 = arith.constant 0 : index
    %3 = vector.load %arg2[%c0, %c0_1] : memref<8x256xf32, #tpu.memory_space<vmem>>, vector<8x256xf32>
    %4 = tpu.iota {dimensions = array<i32: 1>} : vector<8x256xi32>
    %c256_i32 = arith.constant 256 : i32
    %5 = arith.muli %arg1, %c256_i32 : i32
    %6 = vector.broadcast %5 : i32 to vector<8x256xi32>
    %7 = arith.addi %6, %4 : vector<8x256xi32>
    %c256_i32_2 = arith.constant 256 : i32
    %8 = vector.broadcast %c256_i32_2 : i32 to vector<8x256xi32>
    %9 = arith.cmpi slt, %7, %8 : vector<8x256xi32>
    %cst = arith.constant 0.000000e+00 : f32
    %10 = vector.broadcast %cst : f32 to vector<8x256xf32>
    %11 = arith.cmpf ogt, %3, %10 : vector<8x256xf32>
    %12 = arith.andi %11, %9 : vector<8x256xi1>
    %13 = math.absf %3 : vector<8x256xf32>
    %cst_3 = arith.constant 5.000000e-01 : f32
    %14 = vector.broadcast %cst_3 : f32 to vector<8x256xf32>
    %15 = arith.mulf %14, %13 : vector<8x256xf32>
    %16 = math.tanh %15 : vector<8x256xf32>
    %cst_4 = arith.constant 1.000000e+00 : f32
    %17 = vector.broadcast %cst_4 : f32 to vector<8x256xf32>
    %18 = arith.addf %17, %16 : vector<8x256xf32>
    %cst_5 = arith.constant 5.000000e-01 : f32
    %19 = vector.broadcast %cst_5 : f32 to vector<8x256xf32>
    %20 = arith.mulf %19, %18 : vector<8x256xf32>
    %cst_6 = arith.constant 1.000000e+00 : f32
    %21 = vector.broadcast %cst_6 : f32 to vector<8x256xf32>
    %22 = arith.subf %21, %20 : vector<8x256xf32>
    %23 = arith.mulf %13, %22 : vector<8x256xf32>
    %24 = math.log %20 : vector<8x256xf32>
    %25 = arith.subf %23, %24 : vector<8x256xf32>
    %cst_7 = arith.constant 0.000000e+00 : f32
    %26 = vector.broadcast %cst_7 : f32 to vector<8x256xf32>
    %27 = arith.select %12, %25, %26 : vector<8x256xi1>, vector<8x256xf32>
    %c0_8 = arith.constant 0 : index
    %c0_9 = arith.constant 0 : index
    %28 = vector.load %arg3[%c0_8, %c0_9] : memref<8x1xf32, #tpu.memory_space<vmem>>, vector<8x1xf32>
    %cst_10 = arith.constant dense<0.000000e+00> : vector<8xf32>
    %29 = vector.multi_reduction <add>, %27, %cst_10 [1] : vector<8x256xf32> to vector<8xf32>
    %30 = vector.shape_cast %29 : vector<8xf32> to vector<8x1xf32>
    %31 = arith.addf %28, %30 : vector<8x1xf32>
    %c0_11 = arith.constant 0 : index
    %c0_12 = arith.constant 0 : index
    %32 = vector.load %arg3[%c0_11, %c0_12] : memref<8x1xf32, #tpu.memory_space<vmem>>, vector<8x1xf32>
    tpu.vector_store %arg3[%c0_11, %c0_12], %31 {strides = array<i32>} : memref<8x1xf32, #tpu.memory_space<vmem>>, vector<8x1xf32>,
    %c0_13 = arith.constant 0 : index
    %c0_14 = arith.constant 0 : index
    %33 = vector.load %arg4[%c0_13, %c0_14] : memref<8x1xf32, #tpu.memory_space<vmem>>, vector<8x1xf32>
    %34 = arith.extui %12 : vector<8x256xi1> to vector<8x256xi32>
    %35 = arith.sitofp %34 : vector<8x256xi32> to vector<8x256xf32>
    %cst_15 = arith.constant dense<0.000000e+00> : vector<8xf32>
    %36 = vector.multi_reduction <add>, %35, %cst_15 [1] : vector<8x256xf32> to vector<8xf32>
    %37 = vector.shape_cast %36 : vector<8xf32> to vector<8x1xf32>
    %38 = arith.addf %33, %37 : vector<8x1xf32>
    %c0_16 = arith.constant 0 : index
    %c0_17 = arith.constant 0 : index
    %39 = vector.load %arg4[%c0_16, %c0_17] : memref<8x1xf32, #tpu.memory_space<vmem>>, vector<8x1xf32>
    tpu.vector_store %arg4[%c0_16, %c0_17], %38 {strides = array<i32>} : memref<8x1xf32, #tpu.memory_space<vmem>>, vector<8x1xf32>,
    return
  }
  func.func @transform_0(%arg0: i32, %arg1: i32) -> (i32, i32) {
    %c0_i32 = arith.constant 0 : i32
    return %arg0, %arg1 : i32, i32
  }
  func.func @transform_1(%arg0: i32, %arg1: i32) -> (i32, i32) {
    %c0_i32 = arith.constant 0 : i32
    %c0_i32_0 = arith.constant 0 : i32
    return %arg0, %c0_i32 : i32, i32
  }
  func.func @transform_2(%arg0: i32, %arg1: i32) -> (i32, i32) {
    %c0_i32 = arith.constant 0 : i32
    %c0_i32_0 = arith.constant 0 : i32
    return %arg0, %c0_i32 : i32, i32
  }
}

</mosaic_0001>

<bundles_post_ra>
// kernel: tpu_custom_call.1
= control target key start
LH: loop header
LB: loop body
LE: loop exit
PB: predicated region body
PF: predicated region fallthrough
CT: control target
= control target key end

     0   :  { %8 = vsyncpa [#allocation3], 0  ;;  %s679_s0 = inlined_call_operand.hbm [shape: f32[16,256], index: 0, kind: input, shape index: {}]   ;;  %s680_s1 = inlined_call_operand.vmem [shape: f32[16,1], index: 1, kind: output, shape index: {0}]   ;;  %s681_s2 = inlined_call_operand.vmem [shape: f32[16,1], index: 2, kind: output, shape index: {1}]  }
   0x1   :  { %10 = vsyncpa [#allocation3 + $0x1], 0  ;;  %s535_s9 = smov 0   ;;  %s537_s10 = smov 0  }
   0x2   :  { %s539_s11 = smov 0   ;;  %s541_s12 = smov 0  }
   0x3   :  { %s543_s13 = smov 0   ;;  %s545_s14 = smov 0  }
   0x4 LB: > { %s356_s15 = sadd.s32 4294967295, %s516_s14   ;;  %s28_s16 = sadd.s32 1, %s512_s13  ;;  %s516_s14 = sphi %s545_s14, %s16_s14   ;;  %s512_s13 = sphi %s543_s13, %s691_s13   ;;  %s508_s12 = sphi %s541_s12, %s690_s12   ;;  %s504_s11 = sphi %s539_s11, %s689_s11   ;;  %s500_s10 = sphi %s537_s10, %s688_s10   ;;  %s496_s9 = sphi %s535_s9, %s687_s9  }
   0x5   : > { %p30_p0 = scmp.ge.s32.totalorder %s28_s16, 2  ;;  %s37_s17 = sadd.s32 1, %s504_s11 }
   0x6   : > { %p44_p1 = scmp.ne.s32.totalorder %s504_s11, %s500_s10  ;;  %p45_p2 = scmp.eq.s32.totalorder %s516_s14, 0 }
   0x7   : > { %s693_s16 = smov (%p30_p0, %s28_s16), 0  ;;  %p50_p4 = scmp.ne.s32.totalorder %s500_s10, %s496_s9 }
   0x8   : > { %p571_p3 = por %p45_p2, %p44_p1  ;;  %s32_s19 = ssub.s32 %s512_s13, %s693_s16 }
   0x9   : > { %p51_p5 = scmp.eq.s32.totalorder %s356_s15, 0  ;;  %p35_p6 = scmp.eq.s32.totalorder %s32_s19, 0 }
   0xa   : > { %p378_p8 = scmp.lt.s32.totalorder %s516_s14, 2  ;;  %s126_s22 = sand.u32 1, %s504_s11  }
   0xb   : > { %p578_p7 = por %p51_p5, %p50_p4  ;;  %s371_s23 = sshll.u32 %s512_s13, 8 }
   0xc   : > { %s584_s21 = scalar_select %p35_p6, %s504_s11, %s37_s17  }
   0xd   : > { %s360_s24 = sshll.u32 %s126_s22, 4  ;;  %s591_s27 = scalar_lea.hbm %s679_s0, %s371_s23 }
   0xe   : > { %s130_s28 = scalar_lea.vmem [#allocation2], %s360_s24  ;;  %p595_p9 = pnand %p378_p8, %p571_p3 }
   0xf   : > { %s140_s29 = sshll.u32 %s130_s28, 4  ;;  %s127_s3 = scalar_lea.sflag [#allocation3], %s126_s22  ;;  %s599_s29 = int_to_ptr.vmem [resolvable:$true] %s140_s29 }
  0x10   : > { %s436_s4 = scalar_lea.hbm %s591_s27, 256  ;;  %p438_p13 = pneg %p595_p9 }
  0x11   : > { %p437_p12 = scmp.ne.s32.totalorder %s591_s27, %s436_s4  ;;  %s441_s7 = scalar_lea.hbm %s679_s0, 512 }
  0x12   : > { %p442_p2 = scmp.lt.u32.totalorder %s591_s27, %s679_s0  ;;  %p443_p3 = scmp.lt.u32.totalorder %s441_s7, %s436_s4 }
  0x13   : > { %p439_p0 = pnand %p438_p13, %p437_p12  ;;  %p445_p5 = scmp.lt.u32.totalorder %s436_s4, %s591_s27 }
  0x14   : > { %p444_p4 = por %p443_p3, %p442_p2 }
  0x15   : > { %p440_p1 = pneg %p439_p0 }
  0x16   : > { %p446_p6 = por %p445_p5, %p444_p4 }
  0x18   : > { %p447_p8 = pnand %p446_p6, %p440_p1 }
  0x1a   : > { %450 = shalt.err (!%p447_p8)
}
  0x1b   : > { %s451_s15 = scalar_lea.vmem %s599_s29, 256  ;;  %s518_s17 = smov [#allocation2]  }
  0x1c   : > { %p452_p12 = scmp.ne.s32.totalorder %s599_s29, %s451_s15  ;;  %s456_s18 = sshll.u32 %s518_s17, 4  ;;  %s457_s18 = int_to_ptr.vmem [resolvable:$false] %s456_s18 }
  0x1d   : > { %s458_s19 = scalar_lea.vmem %s457_s18, 512  ;;  %p459_p11 = scmp.lt.s32.totalorder %s599_s29, %s457_s18 }
  0x1e   : > { %p454_p0 = pnand %p452_p12, %p438_p13  ;;  %p460_p2 = scmp.lt.s32.totalorder %s458_s19, %s451_s15 }
  0x20   : > { %p455_p10 = pneg %p454_p0  ;;  %p461_p3 = por %p460_p2, %p459_p11 }
  0x22   : > { %p462_p4 = pnand %p461_p3, %p455_p10 }
  0x24   : > { %465 = shalt.err (!%p462_p4)
}
  0x25   : > { %377 = dma.hbm_to_vmem [thread:$0]  (!%p595_p9), %s591_s27, 256, %s599_s29, %s127_s3  }
  0x26   : > { %p685_p1 = scmp.lt.s32.totalorder %s516_s14, 3  ;;  %p686_p5 = scmp.ge.s32.totalorder %s516_s14, 1 }
  0x28   : > { %p146_p13 = pnand %p686_p5, %p685_p1 }
  0x29   : > { %s151_s22 = sand.u32 (!%p146_p13), 1, %s500_s10  }
  0x2a   : > { %149 = sbr.rel (%p146_p13) target bundleno = 238 (0xee), region = 24  ;;  %s364_s23 = sshll.u32 (!%p146_p13), %s151_s22, 4 }
  0x2b   : > { %s152_s24 = scalar_lea.sflag (!%p146_p13), [#allocation3], %s151_s22  ;;  %s155_s25 = scalar_lea.vmem (!%p146_p13), [#allocation2], %s364_s23 }
  0x31   : > { %491 = dma.done.wait (%p578_p7), %s152_s24, 256  }
  0x32   : > { %493 = vsyncadd (%p578_p7), %s152_s24, 4294967040  ;;  %p180_p10 = scmp.lt.s32.totalorder %s508_s12, 1  ;;  %vm192_vm0 = vcmask 7168   ;;  %v519_v0 = vmov 0.0   ;;  %v195_v1 = vld [vmem:[%s155_s25] sm:$0xff]  ;;  %v196_v2 = vld [vmem:[%s155_s25 + $0x8] sm:$0xff] }
  0x33   : > { %v210_v3 = vand.u32 2147483647, %v195_v1  ;;  %v211_v4 = vand.u32 2147483647, %v196_v2  ;;  %vm206_vm1 = vcmp.gt.f32.partialorder %v195_v1, 0.0  ;;  %vm207_vm2 = vcmp.gt.f32.partialorder %v196_v2, 0.0 }
  0x34   : > { %s695_s12 = smov (!%p180_p10, %s508_s12), 1  ;;  %v367_v25 = vsel %vm206_vm1, 1.0, %v519_v0  ;;  %v368_v26 = vsel %vm207_vm2, 1.0, %v519_v0 }
  0x35   : > { %s365_s26 = sshll.u32 %s695_s12, 3  ;;  %v212_v5 = vmul.f32 0.5, %v210_v3  ;;  %v213_v6 = vmul.f32 0.5, %v211_v4  ;;  %v244_v28 = vadd.f32 %v368_v26, %v367_v25 }
  0x36   : > { %s647_s29 = scalar_lea.vmem %s680_s1, %s365_s26  ;;  %s187_s3 = scalar_lea.vmem %s681_s2, %s365_s26 }
  0x37   : > { %193 = vst.msk [vmem:[%s647_s29] sm:$0xff] %vm192_vm0, %v519_v0  ;;  %428 = vtanh.f32 %v212_v5  ;;  %194 = vst.msk [vmem:[%s187_s3] sm:$0xff] %vm192_vm0, %v519_v0 }
  0x38   : > { %430 = vtanh.f32 %v213_v6 }
  0x3e   : > { %v232_v29 = vld [vmem:[%s647_s29] sm:$0xff] }
  0x3f   : > { %v239_v32 = vld [vmem:[%s187_s3] sm:$0xff] }
  0x41   : > { %v429_v7 = vpop.eup %428 }
  0x42   : > { %v431_v8 = vpop.eup %430  ;;  %v216_v9 = vadd.f32 1.0, %v429_v7 }
  0x43   : > { %v217_v10 = vadd.f32 1.0, %v431_v8 }
  0x44   : > { %v218_v11 = vmul.f32 0.5, %v216_v9 }
  0x45   : > { %v219_v12 = vmul.f32 0.5, %v217_v10 }
  0x46   : > { %432 = vlog2.f32 %v218_v11  ;;  %v220_v13 = vsub.f32 1.0, %v218_v11 }
  0x47   : > { %434 = vlog2.f32 %v219_v12  ;;  %v221_v14 = vsub.f32 1.0, %v219_v12 }
  0x48   : > { %v222_v15 = vmul.f32 %v220_v13, %v210_v3 }
  0x49   : > { %v223_v17 = vmul.f32 %v221_v14, %v211_v4 }
  0x50   : > { %v433_v16 = vpop.eup %432 }
  0x51   : > { %v435_v18 = vpop.eup %434  ;;  %v225_v19 = vmul.f32 0.6931472, %v433_v16 }
  0x52   : > { %v227_v20 = vmul.f32 0.6931472, %v435_v18 }
  0x53   : > { %v228_v21 = vsub.f32 %v222_v15, %v225_v19 }
  0x54   : > { %v229_v22 = vsub.f32 %v223_v17, %v227_v20 }
  0x55   : > { %v230_v23 = vsel %vm206_vm1, %v228_v21, 0.0 }
  0x56   : > { %v231_v24 = vsel %vm207_vm2, %v229_v22, 0.0 }
  0x57   : > { %v233_v27 = vadd.f32 %v231_v24, %v230_v23 }
  0x59   : > { %234 = vadd.xlane.f32.xlu0 %v233_v27 }
  0x5d   : > { %245 = vadd.xlane.f32.xlu0 %v244_v28 }
  0xe6   : > { %v235_v30 = vpop.xlane.xlu0 %234 }
  0xe7   : > { %v236_v31 = vadd.f32 %v235_v30, %v232_v29 }
  0xe9   : > { %238 = vst.msk [vmem:[%s647_s29] sm:$0xff] %vm192_vm0, %v236_v31 }
  0xea   : > { %v246_v33 = vpop.xlane.xlu0 %245 }
  0xeb   : > { %v247_v34 = vadd.f32 %v246_v33, %v239_v32 }
  0xed   : > { %248 = vst.msk [vmem:[%s187_s3] sm:$0xff] %vm192_vm0, %v247_v34 }
  0xee PF: > { %s16_s14 = sadd.s32 1, %s516_s14   ;;  %s687_s9 = smov %s500_s10 }
  0xef   : > { %p13_p7 = scmp.ge.s32.totalorder %s16_s14, 4   ;;  %s688_s10 = smov %s504_s11 }
  0xf0   : > { %s689_s11 = smov %s584_s21  ;;  %s690_s12 = smov %s512_s13 }
  0xf1   : > { %s691_s13 = smov %s693_s16  ;;  %15 = sbr.rel (!%p13_p7) target bundleno = 4 (0x4), region = 80 }
  0xf8   :  { %282 = vsyncpa [#allocation3], 1 }
  0xf9   :  { %284 = vsyncpa [#allocation3 + $0x1], 1 }

</bundles_post_ra>
